<compile_context>
chip_gen: v7x
topology: tpu7x:2x2x1
jax: 0.10.0
libtpu: 0.0.40
codegen_flags: <defaults>
</compile_context>

<pallas_src>
import jax
import jax.numpy as jnp
from jax.experimental import pallas as pl
from jax.experimental.pallas import tpu as pltpu

IN_DIM, H1, H2, H3, OUT_DIM = 66, 132, 66, 10, 3
BN_EPS = 1e-5


def nclassifier_kernel(
    x_ref,
    w1_ref, b1_ref,
    w2_ref, b2_ref,
    w3_ref, b3_ref,
    w4_ref, b4_ref,
    o_ref,
):
    x = x_ref[...]

    # layer_1 + ReLU
    h = jnp.dot(x, w1_ref[...], preferred_element_type=jnp.float32) + b1_ref[...]
    h = jnp.maximum(h, 0.0)

    # BatchNorm1d(132) eval-mode affine is pre-folded into w2/b2 (host side).

    # layer_3 + tanh
    h = jnp.dot(h, w2_ref[...], preferred_element_type=jnp.float32) + b2_ref[...]
    h = jnp.tanh(h)

    # layer_5 + tanh
    h = jnp.dot(h, w3_ref[...], preferred_element_type=jnp.float32) + b3_ref[...]
    h = jnp.tanh(h)

    # dropout(p=0.005) is identity at inference time.

    # layer_out + sigmoid
    h = jnp.dot(h, w4_ref[...], preferred_element_type=jnp.float32) + b4_ref[...]
    o_ref[...] = jax.nn.sigmoid(h)


def _round_up(n, m):
    return ((n + m - 1) // m) * m


def fold_batchnorm(params):
    """Fold eval-mode BN (running stats + affine) into the following linear layer."""
    scale = params["gamma"] / jnp.sqrt(params["var"] + BN_EPS)       # (1, H1)
    shift = params["beta"] - params["mean"] * scale                  # (1, H1)
    w2f = scale.reshape(H1, 1) * params["w2"]                        # row-scale of (H1, H2)
    b2f = params["b2"] + shift @ params["w2"]                        # (1, H2)
    return (
        params["w1"], params["b1"],
        w2f, b2f,
        params["w3"], params["b3"],
        params["w4"], params["b4"],
    )


def nclassifier_forward(x, params, *, max_tile=512):
    """x: (B, 66) f32 -> (B, 3) f32."""
    weights = fold_batchnorm(params)

    B = x.shape[0]
    # Tile batch: at least one full 8-sublane vreg, at most `max_tile` rows per step.
    TB = min(max_tile, _round_up(max(B, 1), 8))
    Bp = _round_up(B, TB)
    if Bp != B:
        x = jnp.pad(x, ((0, Bp - B), (0, 0)))
    grid = (Bp // TB,)

    def resident_spec(arr):
        # Whole-array block, constant index map -> stays VMEM-resident across steps.
        nd = arr.ndim
        return pl.BlockSpec(arr.shape, lambda i, _nd=nd: (0,) * _nd)

    in_specs = [pl.BlockSpec((TB, IN_DIM), lambda i: (i, 0))]
    in_specs += [resident_spec(a) for a in weights]
    out_spec = pl.BlockSpec((TB, OUT_DIM), lambda i: (i, 0))

    out = pl.pallas_call(
        nclassifier_kernel,
        grid=grid,
        in_specs=in_specs,
        out_specs=out_spec,
        out_shape=jax.ShapeDtypeStruct((Bp, OUT_DIM), jnp.float32),
        compiler_params=pltpu.CompilerParams(
            dimension_semantics=("parallel",)   # shards batch tiles across TCs on v7x
        ),
    )(x, *weights)

    return out[:B]


def init_params(key):
    """Deterministic synthetic parameters (shapes from NClassifier.__init__)."""
    ks = jax.random.split(key, 12)

    def linear(kw, kb, fan_in, fan_out):
        # PyTorch Linear default init: U(-1/sqrt(fan_in), 1/sqrt(fan_in)).
        bound = 1.0 / jnp.sqrt(float(fan_in))
        w = jax.random.uniform(kw, (fan_in, fan_out), jnp.float32, -bound, bound)
        b = jax.random.uniform(kb, (1, fan_out), jnp.float32, -bound, bound)
        return w, b

    w1, b1 = linear(ks[0], ks[1], IN_DIM, H1)
    w2, b2 = linear(ks[2], ks[3], H1, H2)
    w3, b3 = linear(ks[4], ks[5], H2, H3)
    w4, b4 = linear(ks[6], ks[7], H3, OUT_DIM)

    # BatchNorm1d(132): affine params + running stats (synthetic, deterministic).
    gamma = 1.0 + 0.1 * jax.random.normal(ks[8], (1, H1), jnp.float32)
    beta = 0.1 * jax.random.normal(ks[9], (1, H1), jnp.float32)
    mean = 0.05 * jax.random.normal(ks[10], (1, H1), jnp.float32)
    var = jnp.abs(1.0 + 0.1 * jax.random.normal(ks[11], (1, H1), jnp.float32))

    return dict(
        w1=w1, b1=b1, w2=w2, b2=b2, w3=w3, b3=b3, w4=w4, b4=b4,
        gamma=gamma, beta=beta, mean=mean, var=var,
    )


def reference_forward(x, p):
    """Unfused reference matching the PyTorch module in eval mode."""
    h = jnp.maximum(x @ p["w1"] + p["b1"], 0.0)
    h = (h - p["mean"]) / jnp.sqrt(p["var"] + BN_EPS) * p["gamma"] + p["beta"]
    h = jnp.tanh(h @ p["w2"] + p["b2"])
    h = jnp.tanh(h @ p["w3"] + p["b3"])
    return jax.nn.sigmoid(h @ p["w4"] + p["b4"])


if __name__ == "__main__":
    key = jax.random.PRNGKey(0)
    kx, kp = jax.random.split(key)
    params = init_params(kp)

    # Small aligned batch.
    B = 8
    x = jax.random.normal(kx, (B, IN_DIM), jnp.float32)
    out = jax.block_until_ready(nclassifier_forward(x, params))
    ref = reference_forward(x, params)
    assert out.shape == (B, OUT_DIM)
    assert jnp.allclose(out, ref, atol=1e-4, rtol=1e-4)

    # Ragged (non-multiple-of-8) batch exercises the padding path.
    B2 = 5
    x2 = jax.random.normal(jax.random.PRNGKey(1), (B2, IN_DIM), jnp.float32)
    out2 = jax.block_until_ready(nclassifier_forward(x2, params))
    ref2 = reference_forward(x2, params)
    assert out2.shape == (B2, OUT_DIM)
    assert jnp.allclose(out2, ref2, atol=1e-4, rtol=1e-4)

    print("KERNEL_OK")
</pallas_src>

<mosaic_0001>
module attributes {stable_mosaic.version = 11 : i64} {
  func.func @nclassifier_kernel(%arg0: i32, %arg1: memref<8x66xf32, #tpu.memory_space<vmem>>, %arg2: memref<66x132xf32, #tpu.memory_space<vmem>>, %arg3: memref<1x132xf32, #tpu.memory_space<vmem>>, %arg4: memref<132x66xf32, #tpu.memory_space<vmem>>, %arg5: memref<1x66xf32, #tpu.memory_space<vmem>>, %arg6: memref<66x10xf32, #tpu.memory_space<vmem>>, %arg7: memref<1x10xf32, #tpu.memory_space<vmem>>, %arg8: memref<10x3xf32, #tpu.memory_space<vmem>>, %arg9: memref<1x3xf32, #tpu.memory_space<vmem>>, %arg10: memref<8x3xf32, #tpu.memory_space<vmem>>) attributes {dimension_semantics = [#tpu.dimension_semantics<parallel>], iteration_bounds = array<i64: 1>, scalar_prefetch = 0 : i64, scratch_operands = 0 : i64, tpu.core_type = #tpu.core_type<tc>, window_params = [{transform_indices = @transform_0, window_bounds = array<i64: 8, 66>}, {pipeline_mode = #tpu.pipeline_mode<synchronous>, transform_indices = @transform_1, window_bounds = array<i64: 66, 132>}, {pipeline_mode = #tpu.pipeline_mode<synchronous>, transform_indices = @transform_2, window_bounds = array<i64: 1, 132>}, {pipeline_mode = #tpu.pipeline_mode<synchronous>, transform_indices = @transform_3, window_bounds = array<i64: 132, 66>}, {pipeline_mode = #tpu.pipeline_mode<synchronous>, transform_indices = @transform_4, window_bounds = array<i64: 1, 66>}, {pipeline_mode = #tpu.pipeline_mode<synchronous>, transform_indices = @transform_5, window_bounds = array<i64: 66, 10>}, {pipeline_mode = #tpu.pipeline_mode<synchronous>, transform_indices = @transform_6, window_bounds = array<i64: 1, 10>}, {pipeline_mode = #tpu.pipeline_mode<synchronous>, transform_indices = @transform_7, window_bounds = array<i64: 10, 3>}, {pipeline_mode = #tpu.pipeline_mode<synchronous>, transform_indices = @transform_8, window_bounds = array<i64: 1, 3>}, {transform_indices = @transform_9, window_bounds = array<i64: 8, 3>}]} {
    %c0 = arith.constant 0 : index
    %c0_0 = arith.constant 0 : index
    %0 = vector.load %arg1[%c0, %c0_0] : memref<8x66xf32, #tpu.memory_space<vmem>>, vector<8x66xf32>
    %c0_1 = arith.constant 0 : index
    %c0_2 = arith.constant 0 : index
    %1 = vector.load %arg2[%c0_1, %c0_2] : memref<66x132xf32, #tpu.memory_space<vmem>>, vector<66x132xf32>
    %cst = arith.constant dense<0.000000e+00> : vector<8x132xf32>
    %2 = tpu.matmul %0, %1, %cst {dimension_numbers = #tpu.dot_dimension_numbers<[1], [0], [0], [1], [0, 0, 1, 1], [], []>} : vector<8x66xf32>, vector<66x132xf32>, vector<8x132xf32> -> vector<8x132xf32>
    %c0_3 = arith.constant 0 : index
    %c0_4 = arith.constant 0 : index
    %3 = vector.load %arg3[%c0_3, %c0_4] : memref<1x132xf32, #tpu.memory_space<vmem>>, vector<1x132xf32>
    %4 = vector.broadcast %3 : vector<1x132xf32> to vector<8x132xf32>
    %5 = arith.addf %2, %4 : vector<8x132xf32>
    %cst_5 = arith.constant 0.000000e+00 : f32
    %6 = vector.broadcast %cst_5 : f32 to vector<8x132xf32>
    %7 = arith.maximumf %5, %6 : vector<8x132xf32>
    %c0_6 = arith.constant 0 : index
    %c0_7 = arith.constant 0 : index
    %8 = vector.load %arg4[%c0_6, %c0_7] : memref<132x66xf32, #tpu.memory_space<vmem>>, vector<132x66xf32>
    %cst_8 = arith.constant dense<0.000000e+00> : vector<8x66xf32>
    %9 = tpu.matmul %7, %8, %cst_8 {dimension_numbers = #tpu.dot_dimension_numbers<[1], [0], [0], [1], [0, 0, 1, 1], [], []>} : vector<8x132xf32>, vector<132x66xf32>, vector<8x66xf32> -> vector<8x66xf32>
    %c0_9 = arith.constant 0 : index
    %c0_10 = arith.constant 0 : index
    %10 = vector.load %arg5[%c0_9, %c0_10] : memref<1x66xf32, #tpu.memory_space<vmem>>, vector<1x66xf32>
    %11 = vector.broadcast %10 : vector<1x66xf32> to vector<8x66xf32>
    %12 = arith.addf %9, %11 : vector<8x66xf32>
    %13 = math.tanh %12 : vector<8x66xf32>
    %c0_11 = arith.constant 0 : index
    %c0_12 = arith.constant 0 : index
    %14 = vector.load %arg6[%c0_11, %c0_12] : memref<66x10xf32, #tpu.memory_space<vmem>>, vector<66x10xf32>
    %cst_13 = arith.constant dense<0.000000e+00> : vector<8x10xf32>
    %15 = tpu.matmul %13, %14, %cst_13 {dimension_numbers = #tpu.dot_dimension_numbers<[1], [0], [0], [1], [0, 0, 1, 1], [], []>} : vector<8x66xf32>, vector<66x10xf32>, vector<8x10xf32> -> vector<8x10xf32>
    %c0_14 = arith.constant 0 : index
    %c0_15 = arith.constant 0 : index
    %16 = vector.load %arg7[%c0_14, %c0_15] : memref<1x10xf32, #tpu.memory_space<vmem>>, vector<1x10xf32>
    %17 = vector.broadcast %16 : vector<1x10xf32> to vector<8x10xf32>
    %18 = arith.addf %15, %17 : vector<8x10xf32>
    %19 = math.tanh %18 : vector<8x10xf32>
    %c0_16 = arith.constant 0 : index
    %c0_17 = arith.constant 0 : index
    %20 = vector.load %arg8[%c0_16, %c0_17] : memref<10x3xf32, #tpu.memory_space<vmem>>, vector<10x3xf32>
    %cst_18 = arith.constant dense<0.000000e+00> : vector<8x3xf32>
    %21 = tpu.matmul %19, %20, %cst_18 {dimension_numbers = #tpu.dot_dimension_numbers<[1], [0], [0], [1], [0, 0, 1, 1], [], []>} : vector<8x10xf32>, vector<10x3xf32>, vector<8x3xf32> -> vector<8x3xf32>
    %c0_19 = arith.constant 0 : index
    %c0_20 = arith.constant 0 : index
    %22 = vector.load %arg9[%c0_19, %c0_20] : memref<1x3xf32, #tpu.memory_space<vmem>>, vector<1x3xf32>
    %23 = vector.broadcast %22 : vector<1x3xf32> to vector<8x3xf32>
    %24 = arith.addf %21, %23 : vector<8x3xf32>
    %25 = arith.negf %24 : vector<8x3xf32>
    %26 = math.exp %25 : vector<8x3xf32>
    %cst_21 = arith.constant 1.000000e+00 : f32
    %27 = vector.broadcast %cst_21 : f32 to vector<8x3xf32>
    %28 = arith.addf %27, %26 : vector<8x3xf32>
    %29 = arith.divf %27, %28 : vector<8x3xf32>
    %c0_22 = arith.constant 0 : index
    %c0_23 = arith.constant 0 : index
    %30 = vector.load %arg10[%c0_22, %c0_23] : memref<8x3xf32, #tpu.memory_space<vmem>>, vector<8x3xf32>
    tpu.vector_store %arg10[%c0_22, %c0_23], %29 {strides = array<i32>} : memref<8x3xf32, #tpu.memory_space<vmem>>, vector<8x3xf32>,
    return
  }
  func.func @transform_0(%arg0: i32) -> (i32, i32) {
    %c0_i32 = arith.constant 0 : i32
    %c0_i32_0 = arith.constant 0 : i32
    return %arg0, %c0_i32 : i32, i32
  }
  func.func @transform_1(%arg0: i32) -> (i32, i32) {
    %c0_i32 = arith.constant 0 : i32
    %c0_i32_0 = arith.constant 0 : i32
    %c0_i32_1 = arith.constant 0 : i32
    return %c0_i32, %c0_i32_0 : i32, i32
  }
  func.func @transform_2(%arg0: i32) -> (i32, i32) {
    %c0_i32 = arith.constant 0 : i32
    %c0_i32_0 = arith.constant 0 : i32
    %c0_i32_1 = arith.constant 0 : i32
    return %c0_i32, %c0_i32_0 : i32, i32
  }
  func.func @transform_3(%arg0: i32) -> (i32, i32) {
    %c0_i32 = arith.constant 0 : i32
    %c0_i32_0 = arith.constant 0 : i32
    %c0_i32_1 = arith.constant 0 : i32
    return %c0_i32, %c0_i32_0 : i32, i32
  }
  func.func @transform_4(%arg0: i32) -> (i32, i32) {
    %c0_i32 = arith.constant 0 : i32
    %c0_i32_0 = arith.constant 0 : i32
    %c0_i32_1 = arith.constant 0 : i32
    return %c0_i32, %c0_i32_0 : i32, i32
  }
  func.func @transform_5(%arg0: i32) -> (i32, i32) {
    %c0_i32 = arith.constant 0 : i32
    %c0_i32_0 = arith.constant 0 : i32
    %c0_i32_1 = arith.constant 0 : i32
    return %c0_i32, %c0_i32_0 : i32, i32
  }
  func.func @transform_6(%arg0: i32) -> (i32, i32) {
    %c0_i32 = arith.constant 0 : i32
    %c0_i32_0 = arith.constant 0 : i32
    %c0_i32_1 = arith.constant 0 : i32
    return %c0_i32, %c0_i32_0 : i32, i32
  }
  func.func @transform_7(%arg0: i32) -> (i32, i32) {
    %c0_i32 = arith.constant 0 : i32
    %c0_i32_0 = arith.constant 0 : i32
    %c0_i32_1 = arith.constant 0 : i32
    return %c0_i32, %c0_i32_0 : i32, i32
  }
  func.func @transform_8(%arg0: i32) -> (i32, i32) {
    %c0_i32 = arith.constant 0 : i32
    %c0_i32_0 = arith.constant 0 : i32
    %c0_i32_1 = arith.constant 0 : i32
    return %c0_i32, %c0_i32_0 : i32, i32
  }
  func.func @transform_9(%arg0: i32) -> (i32, i32) {
    %c0_i32 = arith.constant 0 : i32
    %c0_i32_0 = arith.constant 0 : i32
    return %arg0, %c0_i32 : i32, i32
  }
}

</mosaic_0001>

<bundles_post_ra>
// kernel: tpu_custom_call.1
= control target key start
LH: loop header
LB: loop body
LE: loop exit
PB: predicated region body
PF: predicated region fallthrough
CT: control target
= control target key end

     0   :  { %v563_v3 = vmov 0.0   ;;  %v564_v4 = vmov 0.0|0.0   ;;  %vm67_vm0 = vcmask 1041408   ;;  %vm63_vm1 = vcmask 539648   ;;  %s797_s1 = inlined_call_operand.vmem [shape: f32[66,132], index: 1, kind: input, shape index: {}]   ;;  %s798_s3 = inlined_call_operand.vmem [shape: f32[132,66], index: 3, kind: input, shape index: {}]   ;;  %s799_s0 = inlined_call_operand.vmem [shape: f32[8,66], index: 0, kind: input, shape index: {}]   ;;  %s800_s5 = inlined_call_operand.vmem [shape: f32[66,10], index: 5, kind: input, shape index: {}]   ;;  %s801_s2 = inlined_call_operand.vmem [shape: f32[1,132], index: 2, kind: input, shape index: {}]   ;;  %s802_s4 = inlined_call_operand.vmem [shape: f32[1,66], index: 4, kind: input, shape index: {}]   ;;  %s803_s7 = inlined_call_operand.vmem [shape: f32[10,3], index: 7, kind: input, shape index: {}]   ;;  %s804_s6 = inlined_call_operand.vmem [shape: f32[1,10], index: 6, kind: input, shape index: {}]   ;;  %s805_s8 = inlined_call_operand.vmem [shape: f32[1,3], index: 8, kind: input, shape index: {}]   ;;  %s806_s9 = inlined_call_operand.vmem [shape: f32[8,3], index: 9, kind: output, shape index: {}]  }
   0x1   :  { %v34_v0 = vld [vmem:[%s797_s1 + $0x8] sm:$0xff]  ;;  %v36_v1 = vld [vmem:[%s797_s1 + $0x18] sm:$0xff]  ;;  %v33_v2 = vld [vmem:[%s797_s1] sm:$0xff]  ;;  %138 = vmatprep.mubr.f32.mxu0 %v563_v3  ;;  %511 = vmatprep.subr.bf16.mxu1 %v564_v4  ;;  %vm175_vm2 = vcmask 1043456   ;;  %v53_v57 = vlaneseq  ;;  %vm171_vm3 = vcmask 31744   ;;  %vm565_vm4 = vmmov 0  }
   0x2   :  { %v495_v5 = vpack.c.bf16 %v36_v1, %v34_v0  ;;  %v35_v6 = vld [vmem:[%s797_s1 + $0x10] sm:$0xff]  ;;  %v38_v7 = vld [vmem:[%s797_s1 + $0x28] sm:$0xff]  ;;  %v40_v8 = vld [vmem:[%s797_s1 + $0x38] sm:$0xff]  ;;  %vm566_vm5 = vmmov 1   ;;  %vm352_vm7 = vcmask 80896   ;;  %vm435_vm8 = vcmask 23552  }
   0x3   :  { %v497_v9 = vpack.c.bf16 %v35_v6, %v33_v2  ;;  %v499_v10 = vpack.c.bf16 %v40_v8, %v38_v7  ;;  %v37_v11 = vld [vmem:[%s797_s1 + $0x20] sm:$0xff]  ;;  %v39_v12 = vld [vmem:[%s797_s1 + $0x30] sm:$0xff]  ;;  %v42_v13 = vld [vmem:[%s797_s1 + $0x48] sm:$0xff]  ;;  %v54_v58 = vshrl.u32 %v53_v57, 7 }
   0x4   :  { %496 = vmatprep.subr.bf16.mxu0 %v495_v5  ;;  %v44_v14 = vld [vmem:[%s797_s1 + $0x58] sm:$0xff]  ;;  %v501_v15 = vpack.c.bf16 %v39_v12, %v37_v11  ;;  %v41_v17 = vld [vmem:[%s797_s1 + $0x40] sm:$0xff]  ;;  %v43_v18 = vld [vmem:[%s797_s1 + $0x50] sm:$0xff] }
   0x5   :  { %498 = vmatpush1.bf16.msra.mxu0 %v497_v9  ;;  %v503_v16 = vpack.c.bf16 %v44_v14, %v42_v13  ;;  %v46_v19 = vld [vmem:[%s797_s1 + $0x68] sm:$0xff]  ;;  %v48_v20 = vld [vmem:[%s797_s1 + $0x78] sm:$0xff]  ;;  %v147_v21 = vld [vmem:[%s798_s3] sm:$0xff]  ;;  %v505_v26 = vpack.c.bf16 %v43_v18, %v41_v17  ;;  %v55_v59 = vsub.s32 0, %v54_v58  ;;  %v59_v61 = vsub.s32 1, %v54_v58 }
   0x6   :  { %500 = vmatprep.subr.bf16.mxu0 %v499_v10  ;;  %v148_v22 = vld [vmem:[%s798_s3 + $0x8] sm:$0xff]  ;;  %v149_v24 = vld [vmem:[%s798_s3 + $0x10] sm:$0xff]  ;;  %v150_v25 = vld [vmem:[%s798_s3 + $0x18] sm:$0xff]  ;;  %v507_v27 = vpack.c.bf16 %v48_v20, %v46_v19 }
   0x7   :  { %v512_v23 = vpack.c.bf16 %v148_v22, %v147_v21  ;;  %v45_v28 = vld [vmem:[%s797_s1 + $0x60] sm:$0xff]  ;;  %v47_v29 = vld [vmem:[%s797_s1 + $0x70] sm:$0xff]  ;;  %v515_v30 = vpack.c.bf16 %v150_v25, %v149_v24  ;;  %v152_v32 = vld [vmem:[%s798_s3 + $0x28] sm:$0xff] }
   0x8   :  { %v151_v31 = vld [vmem:[%s798_s3 + $0x20] sm:$0xff]  ;;  %v509_v33 = vpack.c.bf16 %v47_v29, %v45_v28  ;;  %v50_v35 = vld [vmem:[%s797_s1 + $0x88] sm:$0x3]  ;;  %v153_v36 = vld [vmem:[%s798_s3 + $0x30] sm:$0xff] }
   0x9   :  { %502 = vmatpush1.bf16.msra.mxu0 %v501_v15  ;;  %513 = vmatpush1.bf16.msra.mxu1 %v512_v23  ;;  %v518_v34 = vpack.c.bf16 %v152_v32, %v151_v31  ;;  %v154_v37 = vld [vmem:[%s798_s3 + $0x38] sm:$0xff]  ;;  %v49_v38 = vld [vmem:[%s797_s1 + $0x80] sm:$0x3]  ;;  %v156_v42 = vld [vmem:[%s798_s3 + $0x48] sm:$0xff] }
   0xa   :  { %504 = vmatprep.subr.bf16.mxu0 %v503_v16  ;;  %514 = vmatprep.subr.bf16.mxu1 %v564_v4  ;;  %v521_v39 = vpack.c.bf16 %v154_v37, %v153_v36  ;;  %v32_v40 = vld [vmem:[%s799_s0] sm:$0xff]  ;;  %v157_v44 = vld [vmem:[%s798_s3 + $0x50] sm:$0xff]  ;;  %v158_v45 = vld [vmem:[%s798_s3 + $0x58] sm:$0xff] }
   0xb   :  { %v155_v41 = vld [vmem:[%s798_s3 + $0x40] sm:$0xff]  ;;  %v527_v46 = vpack.c.bf16 %v158_v45, %v157_v44  ;;  %v160_v48 = vld [vmem:[%s798_s3 + $0x68] sm:$0xff]  ;;  %v161_v50 = vld [vmem:[%s798_s3 + $0x70] sm:$0xff] }
   0xc   :  { %v524_v43 = vpack.c.bf16 %v156_v42, %v155_v41  ;;  %v159_v47 = vld [vmem:[%s798_s3 + $0x60] sm:$0xff]  ;;  %v162_v51 = vld [vmem:[%s798_s3 + $0x78] sm:$0xff]  ;;  %v251_v55 = vld [vmem:[%s800_s5 + $0x8] sm:$0xff] }
   0xd   :  { %506 = vmatpush1.bf16.msra.mxu0 %v505_v26  ;;  %516 = vmatpush1.bf16.msra.mxu1 %v515_v30  ;;  %v530_v49 = vpack.c.bf16 %v160_v48, %v159_v47  ;;  %v533_v52 = vpack.c.bf16 %v162_v51, %v161_v50  ;;  %v163_v53 = vld [vmem:[%s798_s3 + $0x80] sm:$0xf]  ;;  %v252_v8 = vld [vmem:[%s800_s5 + $0x10] sm:$0xff]  ;;  %v253_v9 = vld [vmem:[%s800_s5 + $0x18] sm:$0xff] }
   0xe   :  { %508 = vmatprep.subr.bf16.mxu0 %v507_v27  ;;  %517 = vmatprep.subr.bf16.mxu1 %v564_v4  ;;  %v250_v54 = vld [vmem:[%s800_s5] sm:$0xff]  ;;  %v539_v10 = vpack.c.bf16 %v253_v9, %v252_v8  ;;  %v255_v12 = vld [vmem:[%s800_s5 + $0x28] sm:$0xff]  ;;  %v256_v14 = vld [vmem:[%s800_s5 + $0x30] sm:$0xff] }
   0xf   :  { %v536_v56 = vpack.c.bf16 %v251_v55, %v250_v54  ;;  %v51_v60 = vld [vmem:[%s801_s2] sm:$0x3]  ;;  %v257_v15 = vld [vmem:[%s800_s5 + $0x38] sm:$0xff]  ;;  %vm549_vm6 = vmpackc.low %vm67_vm0, %vm566_vm5 }
  0x10   :  { %v56_v62 = vrot.slane %v51_v60, %v55_v59  ;;  %v60_v63 = vrot.slane %v51_v60, %v59_v61  ;;  %v254_v11 = vld [vmem:[%s800_s5 + $0x20] sm:$0xff]  ;;  %v545_v16 = vpack.c.bf16 %v257_v15, %v256_v14 }
  0x11   :  { %510 = vmatpush1.bf16.msra.mxu0 %v509_v33  ;;  %519 = vmatpush1.bf16.msra.mxu1 %v518_v34  ;;  %v542_v13 = vpack.c.bf16 %v255_v12, %v254_v11  ;;  %v258_v17 = vld [vmem:[%s800_s5 + $0x40] sm:$0x3] }
  0x12   :  { %441 = vmatprep.subr.msk.mxu0 %vm67_vm0, %v50_v35  ;;  %520 = vmatprep.subr.bf16.mxu1 %v564_v4  ;;  %v444_v18 = vld [vmem:[%s802_s4] ss:$0 sm:$0xff] }
  0x13   :  { %v447_v24 = vld [vmem:[%s804_s6] ss:$0 sm:$0xff] }
  0x14   :  { %v450_v29 = vld [vmem:[%s805_s8] ss:$0 sm:$0xff] }
  0x15   :  { %442 = vmatpush1.msk.msra.mxu0 %vm67_vm0, %v49_v38  ;;  %522 = vmatpush1.bf16.msra.mxu1 %v521_v39 }
  0x16   :  { %443 = vmatmul.mubr.msk.f32.vlgmr.msra.gmra.mrb[0].mxu0 %vm63_vm1, %v32_v40  ;;  %523 = vmatprep.subr.bf16.mxu1 %v564_v4 }
  0x17   :  { %535 = vmatprep.subr.bf16.mxu0 %v564_v4  ;;  %485 = vmatprep.mubr.msk.f32.mxu0 %vm565_vm4, %v563_v3 }
  0x18   :  { %537 = vmatpush3.bf16.msra.mxu0 %v536_v56 }
  0x19   :  { %525 = vmatpush1.bf16.msra.mxu1 %v524_v43  ;;  %538 = vmatprep.subr.bf16.mxu0 %v564_v4 }
  0x1a   :  { %526 = vmatprep.subr.bf16.mxu1 %v564_v4 }
  0x1c   :  { %540 = vmatpush3.bf16.msra.mxu0 %v539_v10 }
  0x1d   :  { %528 = vmatpush1.bf16.msra.mxu1 %v527_v46  ;;  %541 = vmatprep.subr.bf16.mxu0 %v564_v4 }
  0x1e   :  { %529 = vmatprep.subr.bf16.mxu1 %v564_v4 }
  0x20   :  { %543 = vmatpush3.bf16.msra.mxu0 %v542_v13 }
  0x21   :  { %531 = vmatpush1.bf16.msra.mxu1 %v530_v49  ;;  %544 = vmatprep.subr.bf16.mxu0 %v564_v4 }
  0x22   :  { %532 = vmatprep.subr.bf16.mxu1 %v564_v4 }
  0x24   :  { %546 = vmatpush3.bf16.msra.mxu0 %v545_v16 }
  0x25   :  { %534 = vmatpush1.bf16.msra.mxu1 %v533_v52  ;;  %483 = vmatprep.subr.mxu0 %v563_v3 }
  0x26   :  { %211 = vmatprep.subr.mxu1 %v563_v3 }
  0x28   :  { %484 = vmatpush3.msk.msra.mxu0 %vm67_vm0, %v258_v17 }
  0x29   :  { %445 = vmatpush1.msk.msra.mxu1 %vm175_vm2, %v163_v53 }
  0x2a   :  { %547 = vmatprep.subr.bf16.mxu1 %v564_v4  ;;  %v344_v4 = vld [vmem:[%s803_s7 + $0x8] sm:$0x3] }
  0xe9   :  { %v140_v0 = vpop.f32.mrb[0].mxu0 }
  0xea   :  { %v141_v1 = vadd.f32 %v140_v0, %v56_v62  ;;  %v142_v2 = vpop.f32.mrb[1].mxu0 }
  0xeb   :  { %v143_v5 = vadd.f32 %v142_v2, %v60_v63 }
  0xec   :  { %v145_v7 = vmax.f32 %v141_v1, 0.0 }
  0xed   :  { %v146_v6 = vmax.f32 %v143_v5, 0.0 }
  0xef   :  { %446 = vmatprep.mubr.msk.f32.mxu1 %vm171_vm3, %v146_v6 }
  0xf0   :  { %244 = vmatmul.mubr.f32.vlgmr.msra.gmra.mrb[0].mxu1 %v145_v7 }
  0xf1   :  { %492 = vmatprep.mubr.msk.f32.mxu1 %vm565_vm4, %v563_v3  ;;  %v343_v3 = vld [vmem:[%s803_s7] sm:$0xff] }
  0xf2   :  { %v548_v23 = vpack.c.bf16 %v344_v4, %v343_v3 }
  0xf4   :  { %550 = vmatpush3.bf16.msk.msra.mxu1 %vm549_vm6, %v548_v23 }
 0x1c3   :  { %v245_v19 = vpop.f32.mrb[0].mxu1 }
 0x1c4   :  { %v246_v20 = vadd.f32 %v444_v18, %v245_v19  ;;  %v247_v21 = vpop.f32.mrb[1].mxu1 }
 0x1c6   :  { %555 = vtanh.f32 %v246_v20 }
 0x1d0   :  { %v556_v22 = vpop.eup %555 }
 0x1d1   :  { %486 = vmatmul.mubr.msk.f32.vlgmr.msra.gmra.mrb[2].mxu0 %vm63_vm1, %v556_v22 }
 0x2a4   :  { %v338_v25 = vpop.f32.mrb[2].mxu0 }
 0x2a5   :  { %v339_v26 = vadd.f32 %v447_v24, %v338_v25  ;;  %v487_v27 = vpop.f32.mrb[3].mxu0 }
 0x2a7   :  { %557 = vtanh.f32 %v339_v26 }
 0x2b1   :  { %v558_v28 = vpop.eup %557 }
 0x2b2   :  { %493 = vmatmul.mubr.msk.f32.vlgmr.msra.gmra.mrb[2].mxu1 %vm352_vm7, %v558_v28 }
 0x385   :  { %v425_v30 = vpop.f32.mrb[2].mxu1 }
 0x386   :  { %v426_v31 = vadd.f32 %v450_v29, %v425_v30  ;;  %v494_v32 = vpop.f32.mrb[3].mxu1 }
 0x388   :  { %v453_v33 = vmul.f32 -1.442695, %v426_v31 }
 0x38a   :  { %559 = vpow2.f32 %v453_v33 }
 0x394   :  { %v560_v34 = vpop.eup %559 }
 0x395   :  { %v432_v35 = vadd.f32 1.0, %v560_v34 }
 0x397   :  { %561 = vrcp.f32 %v432_v35 }
 0x3a1   :  { %v562_v36 = vpop.eup %561 }
 0x3a2   :  { %436 = vst.msk [vmem:[%s806_s9] sm:$0xff] %vm435_vm8, %v562_v36 }

</bundles_post_ra>
